<compile_context>
chip_gen: v7x
topology: tpu7x:2x2x1
jax: 0.10.0
libtpu: 0.0.40
codegen_flags: <defaults>
</compile_context>

<pallas_src>
import functools

import jax
import jax.numpy as jnp
from jax.experimental import pallas as pl
from jax.experimental.pallas import tpu as pltpu

BN_EPS = 1e-5
COUT = 64
KSIZE = 3
STRIDE = 4
CIN = 3
K_PER_BRANCH = CIN * KSIZE * KSIZE      # 27
K_TOTAL = 3 * K_PER_BRANCH              # 81 (lanes padded in VMEM by Mosaic, not in HBM)
C_ALL = 3 * COUT                        # 192


# --------------------------------------------------------------------------- #
# Pass 1: conv (bf16 im2col matmul) -> per-batch channel sum / sum-sq partials
# --------------------------------------------------------------------------- #
def _stats_kernel(p_ref, w_ref, sums_ref):
    # p_ref: (HWP, 81) bf16   one batch's zero-padded im2col rows (3 branches concat)
    # w_ref: (81, 192) bf16   block-diagonal spectral-normalized conv weights
    # sums_ref: (2, 192) f32  [sum ; sum of squares] for this batch's rows
    y = jnp.dot(p_ref[...], w_ref[...], preferred_element_type=jnp.float32)   # (HWP,192)
    s1 = jnp.sum(y, axis=0, keepdims=True)
    s2 = jnp.sum(y * y, axis=0, keepdims=True)
    sums_ref[...] = jnp.concatenate([s1, s2], axis=0)


# --------------------------------------------------------------------------- #
# Pass 2: conv -> BN(scale/shift) -> ELU -> SK attention -> reweight -> store
# --------------------------------------------------------------------------- #
def _main_kernel(p_ref, w_ref, scale_ref, shift_ref, fold_ref, w1_ref, wabc_ref,
                 o_ref, *, hw_real):
    # One batch per grid step. p_ref (HWP,81) bf16; o_ref (HWP,192) f32.
    y = jnp.dot(p_ref[...], w_ref[...], preferred_element_type=jnp.float32)   # (HWP,192)

    # BatchNorm2d (train-mode batch stats folded into scale/shift in the wrapper)
    zb = y * scale_ref[...] + shift_ref[...]

    # ELU(alpha=1); clamped exp so the untaken branch never overflows.
    z = jnp.where(zb > 0, zb, jnp.exp(jnp.minimum(zb, 0.0)) - 1.0)            # (HWP,192)

    # U = x1 + x2 + x3 via MXU fold matmul (avoids 64-lane-offset XLU slices),
    # then masked per-batch spatial mean (padded rows excluded).
    u = jnp.dot(z, fold_ref[...], preferred_element_type=jnp.float32)         # (HWP,64)
    hwp = u.shape[0]
    row_ids = jax.lax.broadcasted_iota(jnp.int32, (hwp, 1), 0)
    mask = (row_ids < hw_real).astype(jnp.float32)
    fs = jnp.sum(u * mask, axis=0, keepdims=True) * (1.0 / hw_real)           # (1,64)

    # fc1 + ReLU, then the three fc2 heads as one (64,192) matmul.
    h = jnp.maximum(jnp.dot(fs, w1_ref[...], preferred_element_type=jnp.float32), 0.0)
    logits = jnp.dot(h, wabc_ref[...], preferred_element_type=jnp.float32)    # (1,192)

    la = logits[:, 0:COUT]
    lb = logits[:, COUT:2 * COUT]
    lc = logits[:, 2 * COUT:3 * COUT]
    m = jnp.maximum(jnp.maximum(la, lb), lc)
    ea = jnp.exp(la - m)
    eb = jnp.exp(lb - m)
    ec = jnp.exp(lc - m)
    inv = 1.0 / (ea + eb + ec)                                                # exact softmax
    s = jnp.concatenate([ea * inv, eb * inv, ec * inv], axis=-1)              # (1,192)

    # Per-batch channel scale applied by broadcast multiply; single lane-dense store.
    o_ref[...] = (z * s).astype(o_ref.dtype)


# --------------------------------------------------------------------------- #
# Glue: patch extraction (channels-last), spectral norm, params, wrapper
# --------------------------------------------------------------------------- #
def _extract_patches_nhwc(x_nhwc, pad, dil, stride=STRIDE, k=KSIZE):
    """x_nhwc: (B,H,W,Cin) -> (B,Ho,Wo,k*k*Cin), feature order (kh, kw, c)."""
    b, h, w, cin = x_nhwc.shape
    ho = (h + 2 * pad - dil * (k - 1) - 1) // stride + 1
    wo = (w + 2 * pad - dil * (k - 1) - 1) // stride + 1
    xp = jnp.pad(x_nhwc, ((0, 0), (pad, pad), (pad, pad), (0, 0)))
    taps = []
    for i in range(k):
        for j in range(k):
            taps.append(xp[:,
                           i * dil: i * dil + stride * (ho - 1) + 1: stride,
                           j * dil: j * dil + stride * (wo - 1) + 1: stride,
                           :])                                   # (B, Ho, Wo, Cin)
    p = jnp.concatenate(taps, axis=-1)                           # (B, Ho, Wo, k*k*Cin)
    return p, ho, wo


def spectral_sigma(w2d, iters=30):
    """Largest singular value via power iteration (SpectralNorm scaling)."""
    v = jnp.ones((w2d.shape[1],), jnp.float32)
    v = v / jnp.linalg.norm(v)
    u = w2d @ v
    for _ in range(iters):
        u = w2d @ v
        u = u / (jnp.linalg.norm(u) + 1e-12)
        v = w2d.T @ u
        v = v / (jnp.linalg.norm(v) + 1e-12)
    return jnp.dot(u, w2d @ v)


def init_params(key, cin=CIN):
    keys = jax.random.split(key, 8)
    w_mats = []
    for i in range(3):
        w = jax.random.normal(keys[i], (COUT, cin, KSIZE, KSIZE), jnp.float32) * 0.2
        sigma = spectral_sigma(w.reshape(COUT, -1))              # PyTorch flatten order
        w_sn = w / sigma                                         # SpectralNorm(conv).weight
        # rows in (kh, kw, cin) order to match the channels-last patch layout
        w_mats.append(jnp.transpose(w_sn, (2, 3, 1, 0)).reshape(KSIZE * KSIZE * cin, COUT))

    # block-diagonal combined conv weight (81, 192): branch k -> rows/cols block k
    w_big = jnp.zeros((K_TOTAL, C_ALL), jnp.float32)
    for k, wm in enumerate(w_mats):
        w_big = w_big.at[k * K_PER_BRANCH:(k + 1) * K_PER_BRANCH,
                         k * COUT:(k + 1) * COUT].set(wm)

    params = {
        "w_big": w_big,                                          # (81, 192)
        "gamma": jnp.ones((1, C_ALL), jnp.float32),              # BatchNorm affine defaults (x3)
        "beta": jnp.zeros((1, C_ALL), jnp.float32),
        # fold matrix: three stacked identities so U = z @ fold on the MXU
        "fold": jnp.concatenate([jnp.eye(COUT, dtype=jnp.float32)] * 3, axis=0),  # (192,64)
        # nn.Linear(64,64,bias=False): y = x @ W.T ; store W.T directly.
        "fc1": jnp.transpose(jax.random.normal(keys[3], (COUT, COUT), jnp.float32) * 0.1),
        "fc2_abc": jnp.concatenate(
            [jnp.transpose(jax.random.normal(keys[4 + j], (COUT, COUT), jnp.float32) * 0.1)
             for j in range(3)], axis=1),                        # (64,192) = [Wa.T|Wb.T|Wc.T]
    }
    return params


@jax.jit
def mkc_block(x, params):
    b, cin, h, w = x.shape
    x_nhwc = jnp.transpose(x, (0, 2, 3, 1))                      # one small relayout in wrapper

    ps, ho, wo = [], None, None
    for pad, dil in ((1, 1), (2, 2), (3, 3)):                    # conv3 / conv7 / conv11
        p, ho, wo = _extract_patches_nhwc(x_nhwc, pad, dil)
        ps.append(p)
    hw = ho * wo
    hwp = max(8, -(-hw // 8) * 8)                                # sublane-multiple rows per batch

    # (B, HWP, 81) bf16 patches — no K padding in HBM.
    p_all = jnp.concatenate(ps, axis=-1).reshape(b, hw, K_TOTAL)
    if hwp != hw:
        p_all = jnp.pad(p_all, ((0, 0), (0, hwp - hw), (0, 0)))
    p_all = p_all.astype(jnp.bfloat16)
    w_big = params["w_big"].astype(jnp.bfloat16)

    cparams = pltpu.CompilerParams(dimension_semantics=("parallel",),
                                   vmem_limit_bytes=32 * 1024 * 1024)

    # ---- pass 1: per-batch channel sum / sum-sq partials (parallel over batch) ----
    stats = pl.pallas_call(
        _stats_kernel,
        out_shape=jax.ShapeDtypeStruct((b, 2, C_ALL), jnp.float32),
        grid=(b,),
        in_specs=[pl.BlockSpec((None, hwp, K_TOTAL), lambda i: (i, 0, 0)),
                  pl.BlockSpec((K_TOTAL, C_ALL), lambda i: (0, 0))],
        out_specs=pl.BlockSpec((None, 2, C_ALL), lambda i: (i, 0, 0)),
        compiler_params=cparams,
    )(p_all, w_big)

    # tiny (2,192) combine + fold gamma/beta into scale/shift (XLA, negligible)
    n_real = b * hw
    tot = jnp.sum(stats, axis=0)                                 # (2, 192)
    mean = tot[0] / n_real
    var = jnp.maximum(tot[1] / n_real - mean * mean, 0.0)        # biased batch variance
    inv_std = jax.lax.rsqrt(var + BN_EPS)
    gamma = params["gamma"][0]
    beta = params["beta"][0]
    scale = (gamma * inv_std).reshape(1, C_ALL)
    shift = (beta - mean * gamma * inv_std).reshape(1, C_ALL)

    # ---- pass 2: conv -> BN -> ELU -> SK attention -> reweight (parallel over batch) ----
    fused = pl.pallas_call(
        functools.partial(_main_kernel, hw_real=hw),
        out_shape=jax.ShapeDtypeStruct((b, hwp, C_ALL), jnp.float32),
        grid=(b,),
        in_specs=[pl.BlockSpec((None, hwp, K_TOTAL), lambda i: (i, 0, 0)),
                  pl.BlockSpec((K_TOTAL, C_ALL), lambda i: (0, 0)),
                  pl.BlockSpec((1, C_ALL), lambda i: (0, 0)),
                  pl.BlockSpec((1, C_ALL), lambda i: (0, 0)),
                  pl.BlockSpec((C_ALL, COUT), lambda i: (0, 0)),
                  pl.BlockSpec((COUT, COUT), lambda i: (0, 0)),
                  pl.BlockSpec((COUT, C_ALL), lambda i: (0, 0))],
        out_specs=pl.BlockSpec((None, hwp, C_ALL), lambda i: (i, 0, 0)),
        compiler_params=cparams,
    )(p_all, w_big, scale, shift, params["fold"], params["fc1"], params["fc2_abc"])

    # back to NCHW (B, 192, Ho, Wo) for PyTorch parity (layout-only, in the wrapper).
    # TODO(synk): drop this transpose if the downstream consumer accepts channels-last.
    return fused[:, :hw, :].reshape(b, ho, wo, C_ALL).transpose(0, 3, 1, 2)


if __name__ == "__main__":
    key = jax.random.PRNGKey(0)
    k_x, k_p = jax.random.split(key)
    x = jax.random.normal(k_x, (2, CIN, 16, 16), jnp.float32)    # NCHW, Cin=3 as the module requires
    params = init_params(k_p)

    out = jax.block_until_ready(mkc_block(x, params))

    assert out.shape == (2, C_ALL, 4, 4), out.shape              # stride-4 convs: 16 -> 4 spatial
    assert bool(jnp.all(jnp.isfinite(out)))
    print("KERNEL_OK")
</pallas_src>

<mosaic_0001>
module attributes {stable_mosaic.version = 11 : i64} {
  func.func @_stats_kernel(%arg0: i32, %arg1: memref<1x16x81xbf16, #tpu.memory_space<vmem>>, %arg2: memref<81x192xbf16, #tpu.memory_space<vmem>>, %arg3: memref<1x2x192xf32, #tpu.memory_space<vmem>>) attributes {dimension_semantics = [#tpu.dimension_semantics<parallel>], iteration_bounds = array<i64: 2>, scalar_prefetch = 0 : i64, scratch_operands = 0 : i64, tpu.core_type = #tpu.core_type<tc>, window_params = [{transform_indices = @transform_0, window_bounds = array<i64: 1, 16, 81>}, {pipeline_mode = #tpu.pipeline_mode<synchronous>, transform_indices = @transform_1, window_bounds = array<i64: 81, 192>}, {transform_indices = @transform_2, window_bounds = array<i64: 1, 2, 192>}]} {
    %c0 = arith.constant 0 : index
    %c0_0 = arith.constant 0 : index
    %c0_1 = arith.constant 0 : index
    %0 = vector.load %arg1[%c0, %c0_0, %c0_1] : memref<1x16x81xbf16, #tpu.memory_space<vmem>>, vector<1x16x81xbf16>
    %1 = vector.shape_cast %0 : vector<1x16x81xbf16> to vector<16x81xbf16>
    %c0_2 = arith.constant 0 : index
    %c0_3 = arith.constant 0 : index
    %2 = vector.load %arg2[%c0_2, %c0_3] : memref<81x192xbf16, #tpu.memory_space<vmem>>, vector<81x192xbf16>
    %cst = arith.constant dense<0.000000e+00> : vector<16x192xf32>
    %3 = tpu.matmul %1, %2, %cst {dimension_numbers = #tpu.dot_dimension_numbers<[1], [0], [0], [1], [0, 0, 1, 1], [], []>} : vector<16x81xbf16>, vector<81x192xbf16>, vector<16x192xf32> -> vector<16x192xf32>
    %cst_4 = arith.constant dense<0.000000e+00> : vector<192xf32>
    %4 = vector.multi_reduction <add>, %3, %cst_4 [0] : vector<16x192xf32> to vector<192xf32>
    %5 = vector.shape_cast %4 : vector<192xf32> to vector<1x192xf32>
    %6 = arith.mulf %3, %3 : vector<16x192xf32>
    %cst_5 = arith.constant dense<0.000000e+00> : vector<192xf32>
    %7 = vector.multi_reduction <add>, %6, %cst_5 [0] : vector<16x192xf32> to vector<192xf32>
    %8 = vector.shape_cast %7 : vector<192xf32> to vector<1x192xf32>
    %9 = tpu.concatenate %5, %8 in 0 : vector<1x192xf32>, vector<1x192xf32> -> vector<2x192xf32>
    %c0_6 = arith.constant 0 : index
    %c0_7 = arith.constant 0 : index
    %c0_8 = arith.constant 0 : index
    %10 = vector.load %arg3[%c0_6, %c0_7, %c0_8] : memref<1x2x192xf32, #tpu.memory_space<vmem>>, vector<1x2x192xf32>
    %11 = vector.shape_cast %10 : vector<1x2x192xf32> to vector<2x192xf32>
    %12 = vector.shape_cast %9 : vector<2x192xf32> to vector<1x2x192xf32>
    tpu.vector_store %arg3[%c0_6, %c0_7, %c0_8], %12 {strides = array<i32>} : memref<1x2x192xf32, #tpu.memory_space<vmem>>, vector<1x2x192xf32>,
    return
  }
  func.func @transform_0(%arg0: i32) -> (i32, i32, i32) {
    %c0_i32 = arith.constant 0 : i32
    %c0_i32_0 = arith.constant 0 : i32
    %c0_i32_1 = arith.constant 0 : i32
    return %arg0, %c0_i32, %c0_i32_0 : i32, i32, i32
  }
  func.func @transform_1(%arg0: i32) -> (i32, i32) {
    %c0_i32 = arith.constant 0 : i32
    %c0_i32_0 = arith.constant 0 : i32
    %c0_i32_1 = arith.constant 0 : i32
    return %c0_i32, %c0_i32_0 : i32, i32
  }
  func.func @transform_2(%arg0: i32) -> (i32, i32, i32) {
    %c0_i32 = arith.constant 0 : i32
    %c0_i32_0 = arith.constant 0 : i32
    %c0_i32_1 = arith.constant 0 : i32
    return %arg0, %c0_i32, %c0_i32_0 : i32, i32, i32
  }
}

module attributes {stable_mosaic.version = 11 : i64} {
  func.func @_main_kernel(%arg0: i32, %arg1: memref<1x16x81xbf16, #tpu.memory_space<vmem>>, %arg2: memref<81x192xbf16, #tpu.memory_space<vmem>>, %arg3: memref<1x192xf32, #tpu.memory_space<vmem>>, %arg4: memref<1x192xf32, #tpu.memory_space<vmem>>, %arg5: memref<192x64xf32, #tpu.memory_space<vmem>>, %arg6: memref<64x64xf32, #tpu.memory_space<vmem>>, %arg7: memref<64x192xf32, #tpu.memory_space<vmem>>, %arg8: memref<1x16x192xf32, #tpu.memory_space<vmem>>) attributes {dimension_semantics = [#tpu.dimension_semantics<parallel>], iteration_bounds = array<i64: 2>, scalar_prefetch = 0 : i64, scratch_operands = 0 : i64, tpu.core_type = #tpu.core_type<tc>, window_params = [{transform_indices = @transform_0, window_bounds = array<i64: 1, 16, 81>}, {pipeline_mode = #tpu.pipeline_mode<synchronous>, transform_indices = @transform_1, window_bounds = array<i64: 81, 192>}, {pipeline_mode = #tpu.pipeline_mode<synchronous>, transform_indices = @transform_2, window_bounds = array<i64: 1, 192>}, {pipeline_mode = #tpu.pipeline_mode<synchronous>, transform_indices = @transform_3, window_bounds = array<i64: 1, 192>}, {pipeline_mode = #tpu.pipeline_mode<synchronous>, transform_indices = @transform_4, window_bounds = array<i64: 192, 64>}, {pipeline_mode = #tpu.pipeline_mode<synchronous>, transform_indices = @transform_5, window_bounds = array<i64: 64, 64>}, {pipeline_mode = #tpu.pipeline_mode<synchronous>, transform_indices = @transform_6, window_bounds = array<i64: 64, 192>}, {transform_indices = @transform_7, window_bounds = array<i64: 1, 16, 192>}]} {
    %c0 = arith.constant 0 : index
    %c0_0 = arith.constant 0 : index
    %c0_1 = arith.constant 0 : index
    %0 = vector.load %arg1[%c0, %c0_0, %c0_1] : memref<1x16x81xbf16, #tpu.memory_space<vmem>>, vector<1x16x81xbf16>
    %1 = vector.shape_cast %0 : vector<1x16x81xbf16> to vector<16x81xbf16>
    %c0_2 = arith.constant 0 : index
    %c0_3 = arith.constant 0 : index
    %2 = vector.load %arg2[%c0_2, %c0_3] : memref<81x192xbf16, #tpu.memory_space<vmem>>, vector<81x192xbf16>
    %cst = arith.constant dense<0.000000e+00> : vector<16x192xf32>
    %3 = tpu.matmul %1, %2, %cst {dimension_numbers = #tpu.dot_dimension_numbers<[1], [0], [0], [1], [0, 0, 1, 1], [], []>} : vector<16x81xbf16>, vector<81x192xbf16>, vector<16x192xf32> -> vector<16x192xf32>
    %c0_4 = arith.constant 0 : index
    %c0_5 = arith.constant 0 : index
    %4 = vector.load %arg3[%c0_4, %c0_5] : memref<1x192xf32, #tpu.memory_space<vmem>>, vector<1x192xf32>
    %5 = vector.broadcast %4 : vector<1x192xf32> to vector<16x192xf32>
    %6 = arith.mulf %3, %5 : vector<16x192xf32>
    %c0_6 = arith.constant 0 : index
    %c0_7 = arith.constant 0 : index
    %7 = vector.load %arg4[%c0_6, %c0_7] : memref<1x192xf32, #tpu.memory_space<vmem>>, vector<1x192xf32>
    %8 = vector.broadcast %7 : vector<1x192xf32> to vector<16x192xf32>
    %9 = arith.addf %6, %8 : vector<16x192xf32>
    %cst_8 = arith.constant 0.000000e+00 : f32
    %10 = vector.broadcast %cst_8 : f32 to vector<16x192xf32>
    %11 = arith.cmpf ogt, %9, %10 : vector<16x192xf32>
    %cst_9 = arith.constant 0.000000e+00 : f32
    %12 = vector.broadcast %cst_9 : f32 to vector<16x192xf32>
    %13 = arith.minimumf %9, %12 : vector<16x192xf32>
    %14 = math.exp %13 : vector<16x192xf32>
    %cst_10 = arith.constant 1.000000e+00 : f32
    %15 = vector.broadcast %cst_10 : f32 to vector<16x192xf32>
    %16 = arith.subf %14, %15 : vector<16x192xf32>
    %17 = arith.select %11, %9, %16 : vector<16x192xi1>, vector<16x192xf32>
    %c0_11 = arith.constant 0 : index
    %c0_12 = arith.constant 0 : index
    %18 = vector.load %arg5[%c0_11, %c0_12] : memref<192x64xf32, #tpu.memory_space<vmem>>, vector<192x64xf32>
    %cst_13 = arith.constant dense<0.000000e+00> : vector<16x64xf32>
    %19 = tpu.matmul %17, %18, %cst_13 {dimension_numbers = #tpu.dot_dimension_numbers<[1], [0], [0], [1], [0, 0, 1, 1], [], []>} : vector<16x192xf32>, vector<192x64xf32>, vector<16x64xf32> -> vector<16x64xf32>
    %20 = tpu.iota {dimensions = array<i32: 0>} : vector<16x1xi32>
    %c16_i32 = arith.constant 16 : i32
    %21 = vector.broadcast %c16_i32 : i32 to vector<16x1xi32>
    %22 = arith.cmpi slt, %20, %21 : vector<16x1xi32>
    %23 = arith.extui %22 : vector<16x1xi1> to vector<16x1xi32>
    %24 = arith.sitofp %23 : vector<16x1xi32> to vector<16x1xf32>
    %25 = vector.broadcast %24 : vector<16x1xf32> to vector<16x64xf32>
    %26 = arith.mulf %19, %25 : vector<16x64xf32>
    %cst_14 = arith.constant dense<0.000000e+00> : vector<64xf32>
    %27 = vector.multi_reduction <add>, %26, %cst_14 [0] : vector<16x64xf32> to vector<64xf32>
    %28 = vector.shape_cast %27 : vector<64xf32> to vector<1x64xf32>
    %cst_15 = arith.constant 6.250000e-02 : f32
    %29 = vector.broadcast %cst_15 : f32 to vector<1x64xf32>
    %30 = arith.mulf %28, %29 : vector<1x64xf32>
    %c0_16 = arith.constant 0 : index
    %c0_17 = arith.constant 0 : index
    %31 = vector.load %arg6[%c0_16, %c0_17] : memref<64x64xf32, #tpu.memory_space<vmem>>, vector<64x64xf32>
    %cst_18 = arith.constant dense<0.000000e+00> : vector<1x64xf32>
    %32 = tpu.matmul %30, %31, %cst_18 {dimension_numbers = #tpu.dot_dimension_numbers<[1], [0], [0], [1], [0, 0, 1, 1], [], []>} : vector<1x64xf32>, vector<64x64xf32>, vector<1x64xf32> -> vector<1x64xf32>
    %cst_19 = arith.constant 0.000000e+00 : f32
    %33 = vector.broadcast %cst_19 : f32 to vector<1x64xf32>
    %34 = arith.maximumf %32, %33 : vector<1x64xf32>
    %c0_20 = arith.constant 0 : index
    %c0_21 = arith.constant 0 : index
    %35 = vector.load %arg7[%c0_20, %c0_21] : memref<64x192xf32, #tpu.memory_space<vmem>>, vector<64x192xf32>
    %cst_22 = arith.constant dense<0.000000e+00> : vector<1x192xf32>
    %36 = tpu.matmul %34, %35, %cst_22 {dimension_numbers = #tpu.dot_dimension_numbers<[1], [0], [0], [1], [0, 0, 1, 1], [], []>} : vector<1x64xf32>, vector<64x192xf32>, vector<1x192xf32> -> vector<1x192xf32>
    %37 = vector.extract_strided_slice %36 {offsets = [0, 0], sizes = [1, 64], strides = [1, 1]} : vector<1x192xf32> to vector<1x64xf32>
    %38 = vector.extract_strided_slice %36 {offsets = [0, 64], sizes = [1, 64], strides = [1, 1]} : vector<1x192xf32> to vector<1x64xf32>
    %39 = vector.extract_strided_slice %36 {offsets = [0, 128], sizes = [1, 64], strides = [1, 1]} : vector<1x192xf32> to vector<1x64xf32>
    %40 = arith.maximumf %37, %38 : vector<1x64xf32>
    %41 = arith.maximumf %40, %39 : vector<1x64xf32>
    %42 = arith.subf %37, %41 : vector<1x64xf32>
    %43 = math.exp %42 : vector<1x64xf32>
    %44 = arith.subf %38, %41 : vector<1x64xf32>
    %45 = math.exp %44 : vector<1x64xf32>
    %46 = arith.subf %39, %41 : vector<1x64xf32>
    %47 = math.exp %46 : vector<1x64xf32>
    %48 = arith.addf %43, %45 : vector<1x64xf32>
    %49 = arith.addf %48, %47 : vector<1x64xf32>
    %cst_23 = arith.constant 1.000000e+00 : f32
    %50 = vector.broadcast %cst_23 : f32 to vector<1x64xf32>
    %51 = arith.divf %50, %49 : vector<1x64xf32>
    %52 = arith.mulf %43, %51 : vector<1x64xf32>
    %53 = arith.mulf %45, %51 : vector<1x64xf32>
    %54 = arith.mulf %47, %51 : vector<1x64xf32>
    %55 = tpu.concatenate %52, %53, %54 in 1 : vector<1x64xf32>, vector<1x64xf32>, vector<1x64xf32> -> vector<1x192xf32>
    %56 = vector.broadcast %55 : vector<1x192xf32> to vector<16x192xf32>
    %57 = arith.mulf %17, %56 : vector<16x192xf32>
    %c0_24 = arith.constant 0 : index
    %c0_25 = arith.constant 0 : index
    %c0_26 = arith.constant 0 : index
    %58 = vector.load %arg8[%c0_24, %c0_25, %c0_26] : memref<1x16x192xf32, #tpu.memory_space<vmem>>, vector<1x16x192xf32>
    %59 = vector.shape_cast %58 : vector<1x16x192xf32> to vector<16x192xf32>
    %60 = vector.shape_cast %57 : vector<16x192xf32> to vector<1x16x192xf32>
    tpu.vector_store %arg8[%c0_24, %c0_25, %c0_26], %60 {strides = array<i32>} : memref<1x16x192xf32, #tpu.memory_space<vmem>>, vector<1x16x192xf32>,
    return
  }
  func.func @transform_0(%arg0: i32) -> (i32, i32, i32) {
    %c0_i32 = arith.constant 0 : i32
    %c0_i32_0 = arith.constant 0 : i32
    %c0_i32_1 = arith.constant 0 : i32
    return %arg0, %c0_i32, %c0_i32_0 : i32, i32, i32
  }
  func.func @transform_1(%arg0: i32) -> (i32, i32) {
    %c0_i32 = arith.constant 0 : i32
    %c0_i32_0 = arith.constant 0 : i32
    %c0_i32_1 = arith.constant 0 : i32
    return %c0_i32, %c0_i32_0 : i32, i32
  }
  func.func @transform_2(%arg0: i32) -> (i32, i32) {
    %c0_i32 = arith.constant 0 : i32
    %c0_i32_0 = arith.constant 0 : i32
    %c0_i32_1 = arith.constant 0 : i32
    return %c0_i32, %c0_i32_0 : i32, i32
  }
  func.func @transform_3(%arg0: i32) -> (i32, i32) {
    %c0_i32 = arith.constant 0 : i32
    %c0_i32_0 = arith.constant 0 : i32
    %c0_i32_1 = arith.constant 0 : i32
    return %c0_i32, %c0_i32_0 : i32, i32
  }
  func.func @transform_4(%arg0: i32) -> (i32, i32) {
    %c0_i32 = arith.constant 0 : i32
    %c0_i32_0 = arith.constant 0 : i32
    %c0_i32_1 = arith.constant 0 : i32
    return %c0_i32, %c0_i32_0 : i32, i32
  }
  func.func @transform_5(%arg0: i32) -> (i32, i32) {
    %c0_i32 = arith.constant 0 : i32
    %c0_i32_0 = arith.constant 0 : i32
    %c0_i32_1 = arith.constant 0 : i32
    return %c0_i32, %c0_i32_0 : i32, i32
  }
  func.func @transform_6(%arg0: i32) -> (i32, i32) {
    %c0_i32 = arith.constant 0 : i32
    %c0_i32_0 = arith.constant 0 : i32
    %c0_i32_1 = arith.constant 0 : i32
    return %c0_i32, %c0_i32_0 : i32, i32
  }
  func.func @transform_7(%arg0: i32) -> (i32, i32, i32) {
    %c0_i32 = arith.constant 0 : i32
    %c0_i32_0 = arith.constant 0 : i32
    %c0_i32_1 = arith.constant 0 : i32
    return %arg0, %c0_i32, %c0_i32_0 : i32, i32, i32
  }
}

</mosaic_0001>

<bundles_post_ra>
// kernel: mul.1
= control target key start
LH: loop header
LB: loop body
LE: loop exit
PB: predicated region body
PF: predicated region fallthrough
CT: control target
= control target key end

     0   :  { %s56_s0 = inlined_call_operand.vmem [shape: f32[1,192], index: 0, kind: input, shape index: {}]   ;;  %s57_s1 = inlined_call_operand.vmem [shape: f32[1,192], index: 1, kind: input, shape index: {}]   ;;  %s58_s2 = inlined_call_operand.vmem [shape: f32[1,192], index: 2, kind: output, shape index: {}]  }
   0x1   :  { %v3_v0 = vld [vmem:[%s56_s0] sm:$0x1]  ;;  %v20_v2 = vld [vmem:[%s56_s0 + $0x1] sm:$0x1] }
   0x2   :  { %v4_v1 = vld [vmem:[%s57_s1] sm:$0x1]  ;;  %v21_v4 = vld [vmem:[%s57_s1 + $0x1] sm:$0x1] }
   0x3   :  { %v7_v3 = vmul.f32 %v4_v1, %v3_v0  ;;  %v16_v5 = vmul.f32 %v21_v4, %v20_v2 }
   0x5   :  { %9 = vst [vmem:[%s58_s2] sm:$0x1] %v7_v3  ;;  %22 = vst [vmem:[%s58_s2 + $0x1] sm:$0x1] %v16_v5 }

// kernel: mkc_block.2
= control target key start
LH: loop header
LB: loop body
LE: loop exit
PB: predicated region body
PF: predicated region fallthrough
CT: control target
= control target key end

     0   :  { %s463_s9 = smov 0   ;;  %s520_s0 = inlined_call_operand.vmem [shape: bf16[2,16,81], index: 0, kind: input, shape index: {}]   ;;  %s521_s1 = inlined_call_operand.vmem [shape: bf16[81,192], index: 1, kind: input, shape index: {}]   ;;  %s522_s2 = inlined_call_operand.vmem [shape: f32[2,2,192], index: 2, kind: output, shape index: {}]  }
   0x1 LB: > { %s383_s10 = sadd.s32 4294967295, %s444_s9   ;;  %p387_p0 = scmp.ge.s32.totalorder %s444_s9, 1  ;;  %s444_s9 = sphi %s463_s9, %s12_s9  }
   0x2   : > { %p112_p1 = scmp.lt.s32.totalorder %s444_s9, 3 }
   0x4   : > { %p113_p2 = pnand %p387_p0, %p112_p1 }
   0x5   : > { %v420_v0 = vld [vmem:[%s521_s1 + $0x4] ss:$8 sps:$4 sm:$0xff] (!%p113_p2)   ;;  %v422_v1 = vld [vmem:[%s521_s1] ss:$8 sps:$4 sm:$0xff] (!%p113_p2)   ;;  %v446_v2 = vmov (!%p113_p2), 0   ;;  %p134_p3 = scmp.lt.s32.totalorder (!%p113_p2), %s383_s10, 1  ;;  %v319_v48 = vlaneseq (!%p113_p2) }
   0x6   : > { %116 = sbr.rel (%p113_p2) target bundleno = 268 (0x10c), region = 28  ;;  %263 = vmatprep.mubr.bf16.mxu0 (!%p113_p2), %v446_v2  ;;  %231 = vmatprep.subr.bf16.mxu0 (!%p113_p2), %v420_v0  ;;  %v423_v3 = vld [vmem:[%s521_s1 + $0x14] ss:$8 sps:$4 sm:$0xff] (!%p113_p2)   ;;  %v425_v4 = vld [vmem:[%s521_s1 + $0x10] ss:$8 sps:$4 sm:$0xff] (!%p113_p2)   ;;  %vm222_vm0 = vcmask (!%p113_p2), 1040384  }
   0x7   : > { %232 = vmatpush1.bf16.msra.mxu0 (!%p113_p2), %v422_v1  ;;  %v426_v5 = vld [vmem:[%s521_s1 + $0x24] ss:$8 sps:$4 sm:$0xff] (!%p113_p2)   ;;  %v428_v6 = vld [vmem:[%s521_s1 + $0x20] ss:$8 sps:$4 sm:$0xff] (!%p113_p2)   ;;  %v429_v7 = vld [vmem:[%s521_s1 + $0x34] ss:$8 sps:$4 sm:$0xff] (!%p113_p2)  }
   0x8   : > { %233 = vmatprep.subr.bf16.mxu0 (!%p113_p2), %v423_v3  ;;  %v157_v8 = vld [vmem:[%s521_s1 + $0x50] sm:$0x11] (!%p113_p2)  ;;  %v432_v10 = vld [vmem:[%s521_s1 + $0x44] ss:$8 sps:$4 sm:$0xff] (!%p113_p2)   ;;  %v224_v12 = vsel (!%p113_p2), %vm222_vm0, 65535, %v446_v2  ;;  %vm218_vm1 = vcmask (!%p113_p2), 662528  }
   0x9   : > { %v431_v9 = vld [vmem:[%s521_s1 + $0x30] ss:$8 sps:$4 sm:$0xff] (!%p113_p2)   ;;  %v404_v11 = vcombine.high (!%p113_p2), %v157_v8, %v157_v8  ;;  %v434_v13 = vld [vmem:[%s521_s1 + $0x40] ss:$8 sps:$4 sm:$0xff] (!%p113_p2)   ;;  %v403_v14 = vcombine.low (!%p113_p2), %v157_v8, %v157_v8  ;;  %vm281_vm2 = vcmask (!%p113_p2), 523264   ;;  %v320_v57 = vshrl.u32 (!%p113_p2), %v319_v48, 7 }
   0xa   : > { %v447_v46 = vmov (!%p113_p2), 1983009808   ;;  %vm324_vm3 = vcmask (!%p113_p2), 1041408   ;;  %vm325_vm4 = vcmask (!%p113_p2), 519170  }
   0xb   : > { %234 = vmatpush1.bf16.msra.mxu0 (!%p113_p2), %v425_v4  ;;  %v229_v15 = vand.u32 (!%p113_p2), %v404_v11, %v224_v12  ;;  %v226_v16 = vand.u32 (!%p113_p2), %v403_v14, %v224_v12  ;;  %v317_v47 = vunpack.c.l.s4 (!%p113_p2), %v447_v46  ;;  %vm326_vm5 = vmor (!%p113_p2), %vm325_vm4, %vm324_vm3 }
   0xc   : > { %235 = vmatprep.subr.bf16.mxu0 (!%p113_p2), %v426_v5 }
   0xd   : > { %s524_s10 = smov (!%p134_p3, %s383_s10), 1  ;;  %v318_v56 = vunpack.c.0.s8 %v317_v47 }
   0xe   : > { %s408_s21 = sshll.u32 %s524_s10, 3  ;;  %s409_s11 = sshll.u32 %s524_s10, 2 }
   0xf   : > { %s138_s24 = scalar_lea.vmem %s520_s0, %s408_s21  ;;  %236 = vmatpush1.bf16.msra.mxu0 %v428_v6  ;;  %v321_v0 = vsub.s32 %v318_v56, %v320_v57  ;;  %s143_s14 = scalar_lea.vmem %s522_s2, %s409_s11 }
  0x10   : > { %237 = vmatprep.subr.bf16.mxu0 %v429_v7  ;;  %v437_v17 = vld [vmem:[%s138_s24] sm:$0xff]  }
  0x13   : > { %238 = vmatpush1.bf16.msra.mxu0 %v431_v9 }
  0x14   : > { %239 = vmatprep.subr.bf16.mxu0 %v432_v10 }
  0x17   : > { %240 = vmatpush1.bf16.msra.mxu0 %v434_v13 }
  0x18   : > { %241 = vmatprep.subr.bf16.mxu0 %v229_v15 }
  0x1b   : > { %242 = vmatpush1.bf16.msra.mxu0 %v226_v16 }
  0x1e   : > { %405 = vmatmul.mubr.msk.bf16.vlgmr.msra.gmra.mrb[0].mxu0 %vm218_vm1, %v437_v17 }
  0xf1   : > { %v265_v18 = vpop.f32.mrb[0].mxu0 }
  0xf2   : > { %v267_v19 = vpop.f32.mrb[1].mxu0  ;;  %v291_v22 = vmul.f32 %v265_v18, %v265_v18 }
  0xf3   : > { %v292_v20 = vmul.f32 %v267_v19, %v267_v19  ;;  %v269_v21 = vpop.f32.mrb[2].mxu0  ;;  %v282_v26 = vsel %vm281_vm2, %v267_v19, 0.0 }
  0xf4   : > { %v274_v23 = vadd.f32 %v269_v21, %v265_v18  ;;  %v293_v24 = vmul.f32 %v269_v21, %v269_v21  ;;  %v271_v25 = vpop.f32.mrb[3].mxu0 }
  0xf5   : > { %v283_v27 = vsel %vm281_vm2, %v271_v25, 0.0  ;;  %v294_v28 = vmul.f32 %v271_v25, %v271_v25  ;;  %v302_v32 = vsel %vm281_vm2, %v292_v20, 0.0 }
  0xf6   : > { %v275_v29 = vrot.slane %v274_v23, 4  ;;  %v295_v30 = vadd.f32 %v293_v24, %v291_v22  ;;  %v284_v31 = vadd.f32 %v283_v27, %v282_v26 }
  0xf7   : > { %v303_v33 = vsel %vm281_vm2, %v294_v28, 0.0 }
  0xf8   : > { %v276_v34 = vadd.f32 %v275_v29, %v274_v23  ;;  %v296_v35 = vrot.slane %v295_v30, 4  ;;  %v285_v36 = vrot.slane %v284_v31, 4  ;;  %v304_v37 = vadd.f32 %v303_v33, %v302_v32 }
  0xfa   : > { %v277_v38 = vrot.slane %v276_v34, 2  ;;  %v297_v39 = vadd.f32 %v296_v35, %v295_v30  ;;  %v286_v40 = vadd.f32 %v285_v36, %v284_v31  ;;  %v305_v41 = vrot.slane %v304_v37, 4 }
  0xfc   : > { %v278_v42 = vadd.f32 %v277_v38, %v276_v34  ;;  %v298_v43 = vrot.slane %v297_v39, 2  ;;  %v287_v44 = vrot.slane %v286_v40, 2  ;;  %v306_v45 = vadd.f32 %v305_v41, %v304_v37 }
  0xfe   : > { %v279_v49 = vrot.slane %v278_v42, 1  ;;  %v299_v50 = vadd.f32 %v298_v43, %v297_v39  ;;  %v288_v51 = vadd.f32 %v287_v44, %v286_v40  ;;  %v307_v52 = vrot.slane %v306_v45, 2 }
 0x100   : > { %v300_v53 = vrot.slane %v299_v50, 1  ;;  %v289_v54 = vrot.slane %v288_v51, 1  ;;  %v308_v55 = vadd.f32 %v307_v52, %v306_v45  ;;  %v280_v58 = vadd.f32 %v279_v49, %v278_v42 }
 0x102   : > { %v301_v59 = vadd.f32 %v300_v53, %v299_v50  ;;  %v309_v60 = vrot.slane %v308_v55, 1  ;;  %v290_v62 = vadd.f32 %v289_v54, %v288_v51 }
 0x104   : > { %v311_v61 = vsel %vm222_vm0, %v280_v58, %v301_v59  ;;  %v310_v63 = vadd.f32 %v309_v60, %v308_v55 }
 0x106   : > { %v312_v1 = vsel %vm222_vm0, %v290_v62, %v310_v63 }
 0x107   : > { %v315_v2 = vcombine.low %v311_v61, %v312_v1 }
 0x109   : > { %v322_v3 = vrot.slane %v315_v2, %v321_v0 }
 0x10b   : > { %327 = vst.msk [vmem:[%s143_s14] sm:$0xf] %vm326_vm5, %v322_v3 }
 0x10c PF: > { %s12_s9 = sadd.s32 1, %s444_s9  }
 0x10d   : > { %p9_p4 = scmp.ge.s32.totalorder %s12_s9, 4  }
 0x10f   :  { %11 = sbr.rel (!%p9_p4) target bundleno = 1 (0x1), region = 58 }

// kernel: mkc_block.3
= control target key start
LH: loop header
LB: loop body
LE: loop exit
PB: predicated region body
PF: predicated region fallthrough
CT: control target
= control target key end

     0   :  { %s1097_s24 = smov 0   ;;  %s1351_s0 = inlined_call_operand.vmem [shape: bf16[2,16,81], index: 0, kind: input, shape index: {}]   ;;  %s1352_s1 = inlined_call_operand.vmem [shape: bf16[81,192], index: 1, kind: input, shape index: {}]   ;;  %s1353_s2 = inlined_call_operand.vmem [shape: f32[1,192], index: 2, kind: input, shape index: {}]   ;;  %s1354_s3 = inlined_call_operand.vmem [shape: f32[1,192], index: 3, kind: input, shape index: {}]   ;;  %s1355_s4 = inlined_call_operand.vmem [shape: f32[192,64], index: 4, kind: input, shape index: {}]   ;;  %s1356_s5 = inlined_call_operand.vmem [shape: f32[64,64], index: 5, kind: input, shape index: {}]   ;;  %s1357_s6 = inlined_call_operand.vmem [shape: f32[64,192], index: 6, kind: input, shape index: {}]   ;;  %s1358_s7 = inlined_call_operand.vmem [shape: f32[2,16,192], index: 7, kind: output, shape index: {}]  }
   0x1 LB: > { %s870_s25 = sadd.s32 4294967295, %s1050_s24   ;;  %p874_p0 = scmp.ge.s32.totalorder %s1050_s24, 1  ;;  %s1050_s24 = sphi %s1097_s24, %s17_s24  }
   0x2   : > { %p237_p1 = scmp.lt.s32.totalorder %s1050_s24, 3 }
   0x4   : > { %p238_p2 = pnand %p874_p0, %p237_p1 }
   0x5   : > { %v1010_v0 = vld [vmem:[%s1352_s1 + $0x4] ss:$8 sps:$4 sm:$0xff] (!%p238_p2)   ;;  %v1012_v1 = vld [vmem:[%s1352_s1] ss:$8 sps:$4 sm:$0xff] (!%p238_p2)   ;;  %v1052_v2 = vmov (!%p238_p2), 0   ;;  %p269_p3 = scmp.lt.s32.totalorder (!%p238_p2), %s870_s25, 1  ;;  %v411_v55 = vlaneseq (!%p238_p2) }
   0x6   : > { %241 = sbr.rel (%p238_p2) target bundleno = 1427 (0x593), region = 48  ;;  %398 = vmatprep.mubr.bf16.mxu0 (!%p238_p2), %v1052_v2  ;;  %366 = vmatprep.subr.bf16.mxu0 (!%p238_p2), %v1010_v0  ;;  %v1013_v3 = vld [vmem:[%s1352_s1 + $0x14] ss:$8 sps:$4 sm:$0xff] (!%p238_p2)   ;;  %v1015_v4 = vld [vmem:[%s1352_s1 + $0x10] ss:$8 sps:$4 sm:$0xff] (!%p238_p2)   ;;  %v1053_v6 = vmov (!%p238_p2), 0.0|0.0  }
   0x7   : > { %367 = vmatpush1.bf16.msra.mxu0 (!%p238_p2), %v1012_v1  ;;  %v1016_v5 = vld [vmem:[%s1352_s1 + $0x24] ss:$8 sps:$4 sm:$0xff] (!%p238_p2)   ;;  %933 = vmatprep.subr.bf16.mxu1 (!%p238_p2), %v1053_v6  ;;  %v1018_v7 = vld [vmem:[%s1352_s1 + $0x20] ss:$8 sps:$4 sm:$0xff] (!%p238_p2)   ;;  %v1019_v8 = vld [vmem:[%s1352_s1 + $0x34] ss:$8 sps:$4 sm:$0xff] (!%p238_p2)  }
   0x8   : > { %368 = vmatprep.subr.bf16.mxu0 (!%p238_p2), %v1013_v3  ;;  %v465_v9 = vld [vmem:[%s1355_s4] sm:$0xff] (!%p238_p2)  ;;  %v466_v10 = vld [vmem:[%s1355_s4 + $0x8] sm:$0xff] (!%p238_p2)  ;;  %v467_v11 = vld [vmem:[%s1355_s4 + $0x10] sm:$0xff] (!%p238_p2)  ;;  %vm357_vm0 = vcmask (!%p238_p2), 1040384   ;;  %vm353_vm1 = vcmask (!%p238_p2), 662528   ;;  %v412_v56 = vshrl.u32 (!%p238_p2), %v411_v55, 7 }
   0x9   : > { %v292_v12 = vld [vmem:[%s1352_s1 + $0x50] sm:$0x11] (!%p238_p2)  ;;  %v934_v13 = vpack.c.bf16 (!%p238_p2), %v466_v10, %v465_v9  ;;  %v468_v14 = vld [vmem:[%s1355_s4 + $0x18] sm:$0xff] (!%p238_p2)  ;;  %v1022_v17 = vld [vmem:[%s1352_s1 + $0x44] ss:$8 sps:$4 sm:$0xff] (!%p238_p2)   ;;  %v359_v21 = vsel (!%p238_p2), %vm357_vm0, 65535, %v1052_v2 }
   0xa   : > { %v1021_v15 = vld [vmem:[%s1352_s1 + $0x30] ss:$8 sps:$4 sm:$0xff] (!%p238_p2)   ;;  %v937_v16 = vpack.c.bf16 (!%p238_p2), %v468_v14, %v467_v11  ;;  %v891_v18 = vcombine.high (!%p238_p2), %v292_v12, %v292_v12  ;;  %v469_v19 = vld [vmem:[%s1355_s4 + $0x20] sm:$0xff] (!%p238_p2)  ;;  %v470_v20 = vld [vmem:[%s1355_s4 + $0x28] sm:$0xff] (!%p238_p2)  ;;  %v890_v23 = vcombine.low (!%p238_p2), %v292_v12, %v292_v12  ;;  %v1232_v57 = vsub.s32 (!%p238_p2), 0, %v412_v56  ;;  %s1056_s27 = smov (!%p238_p2), 64  }
   0xb   : > { %369 = vmatpush1.bf16.msra.mxu0 (!%p238_p2), %v1015_v4  ;;  %935 = vmatpush1.bf16.msra.mxu1 (!%p238_p2), %v934_v13  ;;  %v1024_v22 = vld [vmem:[%s1352_s1 + $0x40] ss:$8 sps:$4 sm:$0xff] (!%p238_p2)   ;;  %v940_v24 = vpack.c.bf16 (!%p238_p2), %v470_v20, %v469_v19  ;;  %v471_v26 = vld [vmem:[%s1355_s4 + $0x30] sm:$0xff] (!%p238_p2)  ;;  %v472_v27 = vld [vmem:[%s1355_s4 + $0x38] sm:$0xff] (!%p238_p2)  ;;  %v417_v59 = vsub.s32 (!%p238_p2), 1, %v412_v56  ;;  %vm489_vm2 = vcmask (!%p238_p2), 523264  }
   0xc   : > { %370 = vmatprep.subr.bf16.mxu0 (!%p238_p2), %v1016_v5  ;;  %936 = vmatprep.subr.bf16.mxu1 (!%p238_p2), %v1053_v6  ;;  %v364_v25 = vand.u32 (!%p238_p2), %v891_v18, %v359_v21  ;;  %v361_v28 = vand.u32 (!%p238_p2), %v890_v23, %v359_v21  ;;  %v943_v29 = vpack.c.bf16 (!%p238_p2), %v472_v27, %v471_v26  ;;  %v473_v30 = vld [vmem:[%s1355_s4 + $0x40] sm:$0xff] (!%p238_p2)  ;;  %v474_v31 = vld [vmem:[%s1355_s4 + $0x48] sm:$0xff] (!%p238_p2)  ;;  %v475_v34 = vld [vmem:[%s1355_s4 + $0x50] sm:$0xff] (!%p238_p2)  ;;  %vm1054_vm7 = vmmov (!%p238_p2), 0  }
   0xd   : > { %s1360_s25 = smov (!%p269_p3, %s870_s25), 1  ;;  %v946_v33 = vpack.c.bf16 %v474_v31, %v473_v30  ;;  %v476_v35 = vld [vmem:[%s1355_s4 + $0x58] sm:$0xff]  ;;  %v477_v37 = vld [vmem:[%s1355_s4 + $0x60] sm:$0xff]  ;;  %v478_v38 = vld [vmem:[%s1355_s4 + $0x68] sm:$0xff] }
   0xe   : > { %s903_s13 = sshll.u32 %s1360_s25, 3  ;;  %v949_v36 = vpack.c.bf16 %v476_v35, %v475_v34  ;;  %v952_v39 = vpack.c.bf16 %v478_v38, %v477_v37  ;;  %v479_v40 = vld [vmem:[%s1355_s4 + $0x70] sm:$0xff]  ;;  %v480_v41 = vld [vmem:[%s1355_s4 + $0x78] sm:$0xff]  ;;  %v481_v43 = vld [vmem:[%s1355_s4 + $0x80] sm:$0xff]  ;;  %s904_s28 = sshll.u32 %s1360_s25, 5 }
   0xf   : > { %s1130_s18 = scalar_lea.vmem %s1351_s0, %s903_s13  ;;  %371 = vmatpush1.bf16.msra.mxu0 %v1018_v7  ;;  %938 = vmatpush1.bf16.msra.mxu1 %v937_v16  ;;  %v955_v42 = vpack.c.bf16 %v480_v41, %v479_v40  ;;  %v482_v44 = vld [vmem:[%s1355_s4 + $0x88] sm:$0xff]  ;;  %v483_v46 = vld [vmem:[%s1355_s4 + $0x90] sm:$0xff]  ;;  %v484_v47 = vld [vmem:[%s1355_s4 + $0x98] sm:$0xff]  ;;  %s278_s8 = scalar_lea.vmem %s1358_s7, %s904_s28 }
  0x10   : > { %372 = vmatprep.subr.bf16.mxu0 %v1019_v8  ;;  %939 = vmatprep.subr.bf16.mxu1 %v1053_v6  ;;  %v1027_v32 = vld [vmem:[%s1130_s18] sm:$0xff]   ;;  %v958_v45 = vpack.c.bf16 %v482_v44, %v481_v43  ;;  %v961_v48 = vpack.c.bf16 %v484_v47, %v483_v46  ;;  %v486_v50 = vld [vmem:[%s1355_s4 + $0xa8] sm:$0xff]  ;;  %v487_v52 = vld [vmem:[%s1355_s4 + $0xb0] sm:$0xff]  ;;  %v1055_v46 = vmov 0.0  }
  0x11   : > { %v485_v49 = vld [vmem:[%s1355_s4 + $0xa0] sm:$0xff]  ;;  %v488_v53 = vld [vmem:[%s1355_s4 + $0xb8] sm:$0xff]  ;;  %v593_v35 = vld [vmem:[%s1356_s5 + $0x8] sm:$0xff] }
  0x12   : > { %v964_v51 = vpack.c.bf16 %v486_v50, %v485_v49  ;;  %v967_v54 = vpack.c.bf16 %v488_v53, %v487_v52  ;;  %v409_v58 = vld [vmem:[%s1353_s2] sm:$0x3]  ;;  %v594_v37 = vld [vmem:[%s1356_s5 + $0x10] sm:$0xff]  ;;  %v595_v38 = vld [vmem:[%s1356_s5 + $0x18] sm:$0xff] }
  0x13   : > { %373 = vmatpush1.bf16.msra.mxu0 %v1021_v15  ;;  %941 = vmatpush1.bf16.msra.mxu1 %v940_v24  ;;  %v425_v60 = vld [vmem:[%s1354_s3] sm:$0x3]  ;;  %v414_v61 = vrot.slane %v409_v58, %v1232_v57  ;;  %v418_v62 = vrot.slane %v409_v58, %v417_v59  ;;  %v597_v41 = vld [vmem:[%s1356_s5 + $0x28] sm:$0xff]  ;;  %v598_v43 = vld [vmem:[%s1356_s5 + $0x30] sm:$0xff] }
  0x14   : > { %374 = vmatprep.subr.bf16.mxu0 %v1022_v17  ;;  %942 = vmatprep.subr.bf16.mxu1 %v1053_v6  ;;  %v430_v63 = vrot.slane %v425_v60, %v1232_v57  ;;  %v434_v1 = vrot.slane %v425_v60, %v417_v59  ;;  %v592_v34 = vld [vmem:[%s1356_s5] sm:$0xff]  ;;  %v599_v44 = vld [vmem:[%s1356_s5 + $0x38] sm:$0xff]  ;;  %v675_v47 = vld [vmem:[%s1357_s6 + $0x8] sm:$0xff] }
  0x15   : > { %v596_v40 = vld [vmem:[%s1356_s5 + $0x20] sm:$0xff] }
  0x17   : > { %375 = vmatpush1.bf16.msra.mxu0 %v1024_v22  ;;  %944 = vmatpush1.bf16.msra.mxu1 %v943_v29 }
  0x18   : > { %376 = vmatprep.subr.bf16.mxu0 %v364_v25  ;;  %945 = vmatprep.subr.bf16.mxu1 %v1053_v6 }
  0x1b   : > { %377 = vmatpush1.bf16.msra.mxu0 %v361_v28  ;;  %947 = vmatpush1.bf16.msra.mxu1 %v946_v33 }
  0x1c   : > { %969 = vmatprep.subr.bf16.mxu0 %v1053_v6  ;;  %948 = vmatprep.subr.bf16.mxu1 %v1053_v6 }
  0x1e   : > { %892 = vmatmul.mubr.msk.bf16.vlgmr.msra.gmra.mrb[0].mxu0 %vm353_vm1, %v1027_v32 }
  0x1f   : > { %950 = vmatpush1.bf16.msra.mxu1 %v949_v36  ;;  %v970_v36 = vpack.c.bf16 %v593_v35, %v592_v34  ;;  %930 = vmatprep.mubr.msk.f32.mxu0 %vm1054_vm7, %v1055_v46 }
  0x20   : > { %951 = vmatprep.subr.bf16.mxu1 %v1053_v6 }
  0x21   : > { %971 = vmatpush3.bf16.msra.mxu0 %v970_v36 }
  0x22   : > { %972 = vmatprep.subr.bf16.mxu0 %v1053_v6 }
  0x23   : > { %953 = vmatpush1.bf16.msra.mxu1 %v952_v39  ;;  %v973_v39 = vpack.c.bf16 %v595_v38, %v594_v37 }
  0x24   : > { %954 = vmatprep.subr.bf16.mxu1 %v1053_v6 }
  0x25   : > { %974 = vmatpush3.bf16.msra.mxu0 %v973_v39 }
  0x26   : > { %975 = vmatprep.subr.bf16.mxu0 %v1053_v6 }
  0x27   : > { %956 = vmatpush1.bf16.msra.mxu1 %v955_v42  ;;  %v976_v42 = vpack.c.bf16 %v597_v41, %v596_v40 }
  0x28   : > { %957 = vmatprep.subr.bf16.mxu1 %v1053_v6 }
  0x29   : > { %977 = vmatpush3.bf16.msra.mxu0 %v976_v42 }
  0x2a   : > { %978 = vmatprep.subr.bf16.mxu0 %v1053_v6 }
  0x2b   : > { %959 = vmatpush1.bf16.msra.mxu1 %v958_v45  ;;  %v979_v45 = vpack.c.bf16 %v599_v44, %v598_v43 }
  0x2c   : > { %960 = vmatprep.subr.bf16.mxu1 %v1053_v6 }
  0x2d   : > { %980 = vmatpush3.bf16.msra.mxu0 %v979_v45 }
  0x2f   : > { %962 = vmatpush1.bf16.msra.mxu1 %v961_v48 }
  0x30   : > { %963 = vmatprep.subr.bf16.mxu1 %v1053_v6 }
  0x33   : > { %965 = vmatpush1.bf16.msra.mxu1 %v964_v51 }
  0x34   : > { %966 = vmatprep.subr.bf16.mxu1 %v1053_v6  ;;  %v677_v6 = vld [vmem:[%s1357_s6 + $0x18] sm:$0xff] }
  0x35   : > { %v981_v48 = vpack.c.bf16 %v677_v6, %v675_v47 }
  0x37   : > { %968 = vmatpush1.bf16.msra.mxu1 %v967_v54  ;;  %982 = vmatprep.subr.bf16.mxu0 %v981_v48 }
  0xf1   : > { %v400_v0 = vpop.f32.mrb[0].mxu0 }
  0xf2   : > { %v421_v2 = vmul.f32 %v414_v61, %v400_v0  ;;  %v402_v3 = vpop.f32.mrb[1].mxu0  ;;  %v679_v0 = vld [vmem:[%s1357_s6 + $0x28] sm:$0xff] }
  0xf3   : > { %v422_v4 = vmul.f32 %v418_v62, %v402_v3  ;;  %v404_v5 = vpop.f32.mrb[2].mxu0 }
  0xf4   : > { %v437_v7 = vadd.f32 %v430_v63, %v421_v2  ;;  %v423_v8 = vmul.f32 %v414_v61, %v404_v5  ;;  %v406_v9 = vpop.f32.mrb[3].mxu0 }
  0xf5   : > { %v438_v10 = vadd.f32 %v434_v1, %v422_v4  ;;  %v424_v11 = vmul.f32 %v418_v62, %v406_v9  ;;  %v674_v62 = vld [vmem:[%s1357_s6] sm:$0xff]  ;;  %v683_v9 = vld [vmem:[%s1357_s6 + $0x48] sm:$0xff] }
  0xf6   : > { %v445_v12 = vmin.f32 %v437_v7, 0.0  ;;  %v439_v13 = vadd.f32 %v430_v63, %v423_v8  ;;  %vm441_vm4 = vcmp.gt.f32.partialorder %v437_v7, 0.0  ;;  %v676_v63 = vld [vmem:[%s1357_s6 + $0x10] sm:$0xff] }
  0xf7   : > { %v446_v14 = vmin.f32 %v438_v10, 0.0  ;;  %v440_v15 = vadd.f32 %v434_v1, %v424_v11  ;;  %vm442_vm3 = vcmp.gt.f32.partialorder %v438_v10, 0.0  ;;  %v681_v1 = vld [vmem:[%s1357_s6 + $0x38] sm:$0xff]  ;;  %v983_v3 = vpack.c.bf16 %v676_v63, %v674_v62  ;;  %v680_v8 = vld [vmem:[%s1357_s6 + $0x30] sm:$0xff] }
  0xf8   : > { %v449_v16 = vmul.f32 1.442695, %v445_v12  ;;  %v447_v17 = vmin.f32 %v439_v13, 0.0  ;;  %vm443_vm6 = vcmp.gt.f32.partialorder %v439_v13, 0.0  ;;  %v985_v5 = vpack.c.bf16 %v681_v1, %v679_v0 }
  0xf9   : > { %v451_v18 = vmul.f32 1.442695, %v446_v14  ;;  %v448_v19 = vmin.f32 %v440_v15, 0.0  ;;  %vm444_vm5 = vcmp.gt.f32.partialorder %v440_v15, 0.0  ;;  %v684_v14 = vld [vmem:[%s1357_s6 + $0x50] sm:$0xff] }
  0xfa   : > { %1028 = vpow2.f32 %v449_v16  ;;  %v453_v20 = vmul.f32 1.442695, %v447_v17  ;;  %v689_v16 = vld [vmem:[%s1357_s6 + $0x78] sm:$0xff] }
  0xfb   : > { %v455_v21 = vmul.f32 1.442695, %v448_v19  ;;  %1030 = vpow2.f32 %v451_v18  ;;  %v686_v19 = vld [vmem:[%s1357_s6 + $0x60] sm:$0xff] }
  0xfc   : > { %1032 = vpow2.f32 %v453_v20  ;;  %v688_v20 = vld [vmem:[%s1357_s6 + $0x70] sm:$0xff] }
  0xfd   : > { %1034 = vpow2.f32 %v455_v21  ;;  %v995_v21 = vpack.c.bf16 %v688_v20, %v686_v19 }
 0x104   : > { %v1029_v22 = vpop.eup %1028 }
 0x105   : > { %v1031_v23 = vpop.eup %1030  ;;  %v893_v24 = vadd.f32 -1.0, %v1029_v22 }
 0x106   : > { %v1033_v25 = vpop.eup %1032  ;;  %v894_v26 = vadd.f32 -1.0, %v1031_v23 }
 0x107   : > { %v1035_v27 = vpop.eup %1034  ;;  %v1246_v30 = vsel %vm441_vm4, %v437_v7, %v893_v24  ;;  %v895_v31 = vadd.f32 -1.0, %v1033_v25  ;;  %v678_v7 = vld [vmem:[%s1357_s6 + $0x20] sm:$0xff] }
 0x108   : > { %v1242_v28 = vsel %vm442_vm3, %v438_v10, %v894_v26  ;;  %v896_v29 = vadd.f32 -1.0, %v1035_v27  ;;  %v685_v10 = vld [vmem:[%s1357_s6 + $0x58] sm:$0xff]  ;;  %v987_v11 = vpack.c.bf16 %v680_v8, %v678_v7 }
 0x109   : > { %897 = vmatprep.mubr.msk.f32.mxu1 %vm489_vm2, %v1242_v28  ;;  %v1253_v33 = vsel %vm443_vm6, %v439_v13, %v895_v31  ;;  %v989_v12 = vpack.c.bf16 %v685_v10, %v683_v9  ;;  %v682_v13 = vld [vmem:[%s1357_s6 + $0x40] sm:$0xff] }
 0x10a   : > { %561 = vmatmul.mubr.f32.vlgmr.msra.gmra.mrb[0].mxu1 %v1246_v30  ;;  %v1249_v32 = vsel %vm444_vm5, %v440_v15, %v896_v29  ;;  %v687_v15 = vld [vmem:[%s1357_s6 + $0x68] sm:$0xff]  ;;  %v991_v17 = vpack.c.bf16 %v684_v14, %v682_v13 }
 0x10b   : > { %898 = vmatprep.mubr.msk.f32.mxu1 %vm489_vm2, %v1249_v32  ;;  %v993_v18 = vpack.c.bf16 %v689_v16, %v687_v15 }
 0x10e   : > { %566 = vmatmul.mubr.f32.gmra.mrb[2].mxu1 %v1253_v33 }
 0x1dd   : > { %v562_v49 = vpop.f32.mrb[0].mxu1 }
 0x1de   : > { %v564_v50 = vpop.f32.mrb[1].mxu1  ;;  %v582_v52 = vsel %vm489_vm2, %v562_v49, 0.0 }
 0x1e1   : > { %v567_v51 = vpop.f32.mrb[2].mxu1 }
 0x1e2   : > { %v583_v53 = vsel %vm489_vm2, %v567_v51, 0.0  ;;  %v569_v54 = vpop.f32.mrb[3].mxu1 }
 0x1e3   : > { %v584_v55 = vadd.f32 %v583_v53, %v582_v52 }
 0x1e5   : > { %v585_v56 = vrot.slane %v584_v55, 4 }
 0x1e7   : > { %v586_v58 = vadd.f32 %v585_v56, %v584_v55 }
 0x1e9   : > { %v587_v59 = vrot.slane %v586_v58, 2 }
 0x1eb   : > { %v588_v60 = vadd.f32 %v587_v59, %v586_v58 }
 0x1ed   : > { %v589_v61 = vrot.slane %v588_v60, 1 }
 0x1ef   : > { %v590_v2 = vadd.f32 %v589_v61, %v588_v60 }
 0x1f1   : > { %v591_v4 = vmul.f32 0.0625, %v590_v2 }
 0x1f3   : > { %931 = vmatmul.mubr.msk.f32.vlgmr.msra.gmra.mrb[4].mxu0 %vm489_vm2, %v591_v4 }
 0x1f4   : > { %984 = vmatpush1.bf16.msra.mxu0 %v983_v3  ;;  %757 = vmatprep.mubr.f32.mxu0 %v1055_v46 }
 0x1f5   : > { %986 = vmatprep.subr.bf16.mxu0 %v985_v5 }
 0x1f8   : > { %988 = vmatpush1.bf16.msra.mxu0 %v987_v11 }
 0x1f9   : > { %990 = vmatprep.subr.bf16.mxu0 %v989_v12 }
 0x1fc   : > { %992 = vmatpush1.bf16.msra.mxu0 %v991_v17 }
 0x1fd   : > { %994 = vmatprep.subr.bf16.mxu0 %v993_v18 }
 0x200   : > { %996 = vmatpush1.bf16.msra.mxu0 %v995_v21 }
 0x2c6   : > { %v669_v22 = vpop.f32.mrb[4].mxu0 }
 0x2c7   : > { %v673_v23 = vmax.f32 %v669_v22, 0.0  ;;  %v932_v24 = vpop.f32.mrb[5].mxu0 }
 0x2c9   : > { %900 = vmatmul.mubr.msk.f32.vlgmr.msra.gmra.mrb[6].mxu0 %vm489_vm2, %v673_v23 }
 0x39c   : > { %v759_v25 = vpop.f32.mrb[6].mxu0 }
 0x39d   : > { %765 = vrot.lane.b32.xlu0 %v759_v25, %s1056_s27  ;;  %v761_v26 = vpop.f32.mrb[7].mxu0 }
 0x40f   : > { %v766_v27 = vpop.permute.xlu0 %765 }
 0x410   : > { %v768_v29 = vmax.f32 %v759_v25, %v766_v27 }
 0x412   : > { %v769_v31 = vmax.f32 %v768_v29, %v761_v26 }
 0x414   : > { %v770_v34 = vsub.f32 %v759_v25, %v769_v31  ;;  %v780_v35 = vsub.f32 %v761_v26, %v769_v31  ;;  %774 = vrot.lane.b32.xlu0 %v769_v31, %s1056_s27 }
 0x416   : > { %v771_v40 = vmul.f32 1.442695, %v770_v34  ;;  %v781_v41 = vmul.f32 1.442695, %v780_v35 }
 0x486   : > { %v775_v36 = vpop.permute.xlu0 %774 }
 0x487   : > { %v777_v37 = vsub.f32 %v759_v25, %v775_v36 }
 0x489   : > { %v778_v38 = vmul.f32 1.442695, %v777_v37 }
 0x48b   : > { %1036 = vpow2.f32 %v778_v38 }
 0x48c   : > { %1038 = vpow2.f32 %v771_v40 }
 0x48d   : > { %1040 = vpow2.f32 %v781_v41 }
 0x495   : > { %v1037_v39 = vpop.eup %1036 }
 0x496   : > { %784 = vrot.lane.b32.xlu1 %v1037_v39, %s1056_s27  ;;  %v1039_v42 = vpop.eup %1038 }
 0x497   : > { %v1041_v45 = vpop.eup %1040 }
 0x508   : > { %v785_v43 = vpop.permute.xlu1 %784 }
 0x509   : > { %v787_v44 = vadd.f32 %v1039_v42, %v785_v43 }
 0x50b   : > { %v788_v46 = vadd.f32 %v1041_v45, %v787_v44 }
 0x50d   : > { %1042 = vrcp.f32 %v788_v46 }
 0x517   : > { %v1043_v47 = vpop.eup %1042 }
 0x518   : > { %793 = vrot.lane.b32.xlu1 %v1043_v47, %s1056_s27  ;;  %v791_v6 = vmul.f32 %v1043_v47, %v1039_v42  ;;  %v797_v48 = vmul.f32 %v1043_v47, %v1041_v45 }
 0x51a   : > { %v806_v49 = vrot.slane %v797_v48, %v1232_v57 }
 0x51c   : > { %v808_v50 = vmul.f32 %v806_v49, %v1242_v28  ;;  %v810_v51 = vmul.f32 %v806_v49, %v1249_v32 }
 0x51e   : > { %812 = vst.msk [vmem:[%s278_s8 + $0x8] sm:$0xff] %vm489_vm2, %v808_v50  ;;  %814 = vst.msk [vmem:[%s278_s8 + $0x18] sm:$0xff] %vm489_vm2, %v810_v51 }
 0x58a   : > { %v794_v52 = vpop.permute.xlu1 %793 }
 0x58b   : > { %v796_v53 = vmul.f32 %v1037_v39, %v794_v52 }
 0x58d   : > { %v798_v54 = vsel %vm489_vm2, %v791_v6, %v796_v53 }
 0x58e   : > { %v802_v55 = vrot.slane %v798_v54, %v1232_v57 }
 0x590   : > { %v807_v56 = vmul.f32 %v802_v55, %v1246_v30  ;;  %v809_v58 = vmul.f32 %v802_v55, %v1253_v33 }
 0x592   : > { %811 = vst [vmem:[%s278_s8] sm:$0xff] %v807_v56  ;;  %813 = vst [vmem:[%s278_s8 + $0x10] sm:$0xff] %v809_v58 }
 0x593 PF: > { %s17_s24 = sadd.s32 1, %s1050_s24  }
 0x594   : > { %p14_p4 = scmp.ge.s32.totalorder %s17_s24, 4  }
 0x596   :  { %16 = sbr.rel (!%p14_p4) target bundleno = 1 (0x1), region = 78 }

</bundles_post_ra>
